<compile_context>
chip_gen: v7x
topology: tpu7x:2x2x1
jax: 0.10.0
libtpu: 0.0.40
codegen_flags: <defaults>
</compile_context>

<pallas_src>
import functools
import math

import jax
import jax.numpy as jnp
from jax import lax
from jax.experimental import pallas as pl
from jax.experimental.pallas import tpu as pltpu

LN_EPS = 1e-5
_MIB = 1024 * 1024


def _round_up(n, m):
    return ((n + m - 1) // m) * m


def _layer_norm_f32(v, gamma, beta):
    """Single-pass f32 LayerNorm (one sum + one sum-of-squares reduction)."""
    inv_d = 1.0 / v.shape[-1]
    s = jnp.sum(v, axis=-1, keepdims=True)
    ss = jnp.sum(v * v, axis=-1, keepdims=True)
    mean = s * inv_d
    var = jnp.maximum(ss * inv_d - mean * mean, 0.0)
    return (v - mean) * lax.rsqrt(var + LN_EPS) * gamma + beta


# ---------------------------------------------------------------------------
# Path A: weights fully VMEM-resident, 1-D "parallel" grid over row tiles,
# in-kernel (static, unrolled) chunk loop over d_inner.
# ---------------------------------------------------------------------------
def _ff_resident_kernel(x_ref, w1_ref, b1_ref, w2_ref, b2_ref, g_ref, be_ref,
                        o_ref, *, pre_lnorm, nk, n_chunks, mxu_dtype):
    gamma = g_ref[...]                    # (1, d_model) f32
    beta = be_ref[...]                    # (1, d_model) f32
    b2 = b2_ref[...]                      # (1, d_model) f32

    x_nat = x_ref[...]                    # (TM, d_model) native dtype
    x_f32 = x_nat.astype(jnp.float32)     # LN / residual path in f32

    if pre_lnorm:
        core_in = _layer_norm_f32(x_f32, gamma, beta).astype(mxu_dtype)
    else:
        core_in = x_nat.astype(mxu_dtype)

    # CoreNet: Linear -> ReLU -> (Dropout=id) -> Linear -> (Dropout=id),
    # chunked over d_inner: the bias/ReLU/cast epilogue (VPU) of chunk j
    # overlaps the MXU work of chunk j+1; live intermediate is (TM, nk).
    acc = jnp.zeros(o_ref.shape, jnp.float32)
    for j in range(n_chunks):             # static loop -> static ref slices
        lo = j * nk
        hi = lo + nk
        h = jnp.dot(core_in, w1_ref[:, lo:hi],
                    preferred_element_type=jnp.float32) + b1_ref[:, lo:hi]
        h = jnp.maximum(h, 0.0).astype(mxu_dtype)   # bf16 re-cast (intentional)
        acc = acc + jnp.dot(h, w2_ref[lo:hi, :],
                            preferred_element_type=jnp.float32)
    core_out = acc + b2

    if pre_lnorm:
        out = core_out + x_f32
    else:
        out = _layer_norm_f32(x_f32 + core_out, gamma, beta)
    o_ref[...] = out.astype(o_ref.dtype)


# ---------------------------------------------------------------------------
# Path B: weights streamed from HBM in d_inner chunks (2-D grid, k innermost).
# Residency-guard fallback for small-VMEM parts (v7x) / very large d_inner.
# ---------------------------------------------------------------------------
def _ff_stream_kernel(x_ref, w1_ref, b1_ref, w2_ref, b2_ref, g_ref, be_ref,
                      o_ref, cin_ref, acc_ref, *, pre_lnorm, mxu_dtype):
    k = pl.program_id(1)

    @pl.when(k == 0)
    def _init():
        acc_ref[...] = jnp.zeros_like(acc_ref)
        if pre_lnorm:
            cin_ref[...] = _layer_norm_f32(
                x_ref[...].astype(jnp.float32), g_ref[...], be_ref[...]
            ).astype(cin_ref.dtype)
        else:
            cin_ref[...] = x_ref[...].astype(cin_ref.dtype)

    h = jnp.dot(cin_ref[...], w1_ref[...],
                preferred_element_type=jnp.float32) + b1_ref[...]
    h = jnp.maximum(h, 0.0).astype(mxu_dtype)
    acc_ref[...] += jnp.dot(h, w2_ref[...], preferred_element_type=jnp.float32)

    @pl.when(k == pl.num_programs(1) - 1)
    def _finalize():
        x_f32 = x_ref[...].astype(jnp.float32)
        core_out = acc_ref[...] + b2_ref[...]
        if pre_lnorm:
            out = core_out + x_f32
        else:
            out = _layer_norm_f32(x_f32 + core_out, g_ref[...], be_ref[...])
        o_ref[...] = out.astype(o_ref.dtype)


def _vmem_capacity_bytes():
    try:
        info = pltpu.get_tpu_info()
        cap = getattr(info, "vmem_capacity_bytes", None)
        if cap and int(cap) >= 16 * _MIB:
            return int(cap)
    except Exception:
        pass
    return 64 * _MIB          # conservative (v7x-sized) fallback


def _pick_inner_chunk(d_inner, requested):
    if requested is not None:
        if not (requested == d_inner
                or (requested % 128 == 0 and d_inner % requested == 0)):
            raise ValueError("inner_chunk must divide d_inner and be a "
                             "multiple of 128 (or equal d_inner)")
        return requested
    for nk in (512, 1024, 256, 128):      # review: NK = 512-1024 preferred
        if nk <= d_inner and d_inner % nk == 0:
            return nk
    return d_inner


def positionwise_ff(x, w1, b1, w2, b2, gamma, beta, *, pre_lnorm=False,
                    block_rows=None, inner_chunk=None, force_stream=False):
    """Transformer-XL PositionwiseFF forward.  x: (..., d_model)."""
    orig_shape = x.shape
    d_model = orig_shape[-1]
    d_inner = w1.shape[1]

    n_rows = 1
    for s in orig_shape[:-1]:
        n_rows *= s

    # Feed the MXU bf16 even for f32 callers; accumulation stays f32 and
    # LayerNorm / residual stay f32, so only the matmul inputs are rounded.
    mxu_dtype = jnp.bfloat16 if w1.dtype == jnp.float32 else w1.dtype
    w1c = w1.astype(mxu_dtype)
    w2c = w2.astype(mxu_dtype)
    b1_2 = b1.reshape(1, d_inner).astype(jnp.float32)
    b2_2 = b2.reshape(1, d_model).astype(jnp.float32)
    g_2 = gamma.reshape(1, d_model).astype(jnp.float32)
    be_2 = beta.reshape(1, d_model).astype(jnp.float32)

    x_isz = jnp.dtype(x.dtype).itemsize
    w_isz = jnp.dtype(mxu_dtype).itemsize

    vmem_cap = _vmem_capacity_bytes()
    # Generation-aware scoped-VMEM budget: use most of a 128 MiB part
    # (v5e/v6e) but leave ~18% headroom on a 64 MiB part (v7x).
    big_vmem = vmem_cap >= 96 * _MIB
    budget = 104 * _MIB if big_vmem else int(vmem_cap * 0.82)

    # Row tile: big on 128 MiB parts; aim for >= 2 tiles so a 2-TensorCore
    # chip (v7x) can shard the "parallel" axis; sublane-pack aligned.
    pack = max(8, 32 // max(1, x_isz))     # 8 (f32) / 16 (bf16) / 32 (int8)
    if block_rows is None:
        block_rows = 512 if big_vmem else 256
    block_rows = max(pack, _round_up(block_rows, pack))
    if n_rows <= pack:
        tm = n_rows                         # single full-extent block (legal)
    elif n_rows >= 2 * block_rows:
        tm = block_rows
    else:
        tm = min(block_rows, max(pack, _round_up(pl.cdiv(n_rows, 2), pack)))
    n_row_tiles = pl.cdiv(n_rows, tm)

    nk = _pick_inner_chunk(d_inner, inner_chunk)

    x2 = x.reshape(n_rows, d_model)
    out_shape = jax.ShapeDtypeStruct((n_rows, d_model), x.dtype)

    # Itemized VMEM estimate for the resident path.
    weight_bytes = 2 * d_model * d_inner * w_isz
    small_bytes = (d_inner + 3 * d_model) * 4            # f32 b1,b2,gamma,beta
    io_bytes = 2 * 2 * tm * d_model * x_isz              # x/out, double-buffered
    interm_res = (tm * d_model * (4 + 4 + w_isz)         # x_f32, acc, core_in
                  + tm * nk * (4 + w_isz))               # h f32 + h cast
    resident_need = weight_bytes + small_bytes + io_bytes + interm_res

    use_stream = force_stream or resident_need > budget

    flops = 4 * n_rows * d_model * d_inner               # two matmuls
    transcendentals = n_rows                              # one rsqrt per row

    if not use_stream:
        # ---- Path A: resident weights ----
        vmem_limit = int(min(budget,
                             max(1.25 * resident_need + 4 * _MIB, 16 * _MIB)))
        cost = pl.CostEstimate(
            flops=flops, transcendentals=transcendentals,
            bytes_accessed=2 * n_rows * d_model * x_isz + weight_bytes + small_bytes)

        def const(shape):                  # grid-invariant, single-buffered
            return pl.BlockSpec(shape, lambda i: (0, 0),
                                pipeline_mode=pl.Buffered(1))

        kernel = functools.partial(
            _ff_resident_kernel, pre_lnorm=pre_lnorm, nk=nk,
            n_chunks=d_inner // nk, mxu_dtype=mxu_dtype)

        out = pl.pallas_call(
            kernel,
            out_shape=out_shape,
            grid=(n_row_tiles,),
            in_specs=[
                pl.BlockSpec((tm, d_model), lambda i: (i, 0)),   # x (streamed)
                const((d_model, d_inner)),                       # w1 (resident)
                const((1, d_inner)),                             # b1
                const((d_inner, d_model)),                       # w2
                const((1, d_model)),                             # b2
                const((1, d_model)),                             # gamma
                const((1, d_model)),                             # beta
            ],
            out_specs=pl.BlockSpec((tm, d_model), lambda i: (i, 0)),
            compiler_params=pltpu.CompilerParams(
                dimension_semantics=("parallel",),
                vmem_limit_bytes=vmem_limit),
            cost_estimate=cost,
        )(x2, w1c, b1_2, w2c, b2_2, g_2, be_2)
    else:
        # ---- Path B: weights streamed from HBM in d_inner chunks ----
        if inner_chunk is not None:
            cands = [nk]
        else:
            cands = [c for c in (2048, 1024, 512, 256, 128)
                     if c <= d_inner and d_inner % c == 0] or [d_inner]
        fixed = (io_bytes                                   # x/out tiles
                 + tm * d_model * (4 + w_isz)               # acc + core_in scratch
                 + 3 * d_model * 4)                         # b2, gamma, beta
        nk_s = cands[-1]
        for c in cands:                                     # largest chunk that fits
            per_chunk = (2 * 2 * d_model * c * w_isz        # w1+w2 chunks, 2 buffers
                         + 2 * c * 4                        # b1 chunk
                         + tm * c * (4 + w_isz))            # h f32 + h cast
            if fixed + per_chunk <= budget:
                nk_s = c
                break
        n_k = d_inner // nk_s
        stream_need = fixed + (2 * 2 * d_model * nk_s * w_isz + 2 * nk_s * 4
                               + tm * nk_s * (4 + w_isz))
        vmem_limit = int(min(budget,
                             max(1.25 * stream_need + 4 * _MIB, 16 * _MIB)))
        cost = pl.CostEstimate(
            flops=flops, transcendentals=transcendentals,
            bytes_accessed=(2 * n_rows * d_model * x_isz
                            + n_row_tiles * weight_bytes + small_bytes))

        def const2(shape):
            return pl.BlockSpec(shape, lambda i, k: (0, 0),
                                pipeline_mode=pl.Buffered(1))

        kernel = functools.partial(_ff_stream_kernel, pre_lnorm=pre_lnorm,
                                   mxu_dtype=mxu_dtype)

        out = pl.pallas_call(
            kernel,
            out_shape=out_shape,
            grid=(n_row_tiles, n_k),
            in_specs=[
                pl.BlockSpec((tm, d_model), lambda i, k: (i, 0)),    # x (held over k)
                pl.BlockSpec((d_model, nk_s), lambda i, k: (0, k)),  # w1 chunk
                pl.BlockSpec((1, nk_s), lambda i, k: (0, k)),        # b1 chunk
                pl.BlockSpec((nk_s, d_model), lambda i, k: (k, 0)),  # w2 chunk
                const2((1, d_model)),                                # b2
                const2((1, d_model)),                                # gamma
                const2((1, d_model)),                                # beta
            ],
            out_specs=pl.BlockSpec((tm, d_model), lambda i, k: (i, 0)),
            scratch_shapes=[pltpu.VMEM((tm, d_model), mxu_dtype),    # core_in
                            pltpu.VMEM((tm, d_model), jnp.float32)],  # accumulator
            compiler_params=pltpu.CompilerParams(
                dimension_semantics=("parallel", "arbitrary"),
                vmem_limit_bytes=vmem_limit),
            cost_estimate=cost,
        )(x2, w1c, b1_2, w2c, b2_2, g_2, be_2)

    return out.reshape(orig_shape)


def _reference(x, w1, b1, w2, b2, gamma, beta, *, pre_lnorm=False,
               matmul_dtype=None):
    """Pure-JAX reference; matmul_dtype emulates the kernel's MXU rounding."""
    x32 = x.astype(jnp.float32)
    g = gamma.astype(jnp.float32)
    be = beta.astype(jnp.float32)

    def ln(v):
        m = jnp.mean(v, axis=-1, keepdims=True)
        c = v - m
        var = jnp.mean(c * c, axis=-1, keepdims=True)
        return c * lax.rsqrt(var + LN_EPS) * g + be

    def mm(a, w):
        if matmul_dtype is not None:
            a = a.astype(matmul_dtype)
            w = w.astype(matmul_dtype)
        return jnp.dot(a, w, preferred_element_type=jnp.float32)

    core_in = ln(x32) if pre_lnorm else x32
    h = jnp.maximum(mm(core_in, w1) + b1.astype(jnp.float32), 0.0)
    if matmul_dtype is not None:
        h = h.astype(matmul_dtype)
    core = mm(h, w2) + b2.astype(jnp.float32)
    return core + x32 if pre_lnorm else ln(x32 + core)


if __name__ == "__main__":
    key = jax.random.PRNGKey(0)

    def make_params(kp, d_model, d_inner, dtype=jnp.float32):
        kw1, kb1, kw2, kb2 = jax.random.split(kp, 4)
        bound1 = 1.0 / math.sqrt(d_model)
        bound2 = 1.0 / math.sqrt(d_inner)
        w1 = jax.random.uniform(kw1, (d_model, d_inner), jnp.float32,
                                -bound1, bound1).astype(dtype)
        b1 = jax.random.uniform(kb1, (d_inner,), jnp.float32,
                                -bound1, bound1).astype(dtype)
        w2 = jax.random.uniform(kw2, (d_inner, d_model), jnp.float32,
                                -bound2, bound2).astype(dtype)
        b2 = jax.random.uniform(kb2, (d_model,), jnp.float32,
                                -bound2, bound2).astype(dtype)
        gamma = jnp.ones((d_model,), dtype)
        beta = jnp.zeros((d_model,), dtype)
        return w1, b1, w2, b2, gamma, beta

    def check(out, ref, tag, atol, rtol):
        out = jax.block_until_ready(out)
        ok = jnp.allclose(out.astype(jnp.float32), ref.astype(jnp.float32),
                          atol=atol, rtol=rtol)
        assert bool(ok), f"mismatch vs reference: {tag}"

    # 1) Small Transformer-XL-like shapes (seq, batch, d_model), f32, resident.
    seq, batch, d_model, d_inner = 8, 2, 32, 64
    kx, kp = jax.random.split(key)
    x = jax.random.normal(kx, (seq, batch, d_model), dtype=jnp.float32)
    params = make_params(kp, d_model, d_inner)
    for pre in (False, True):
        out = positionwise_ff(x, *params, pre_lnorm=pre)
        ref = _reference(x, *params, pre_lnorm=pre, matmul_dtype=jnp.bfloat16)
        assert out.shape == x.shape and out.dtype == x.dtype
        check(out, ref, f"resident pre_lnorm={pre}", 1e-2, 1e-2)

    # 2) Larger dims: ragged last row tile + multi-chunk in-kernel loop.
    seq2, batch2, d_model2, d_inner2 = 9, 2, 128, 512
    kx2, kp2 = jax.random.split(kp)
    x2 = jax.random.normal(kx2, (seq2, batch2, d_model2), dtype=jnp.float32)
    params2 = make_params(kp2, d_model2, d_inner2)
    out = positionwise_ff(x2, *params2, pre_lnorm=False, inner_chunk=128)
    ref = _reference(x2, *params2, pre_lnorm=False, matmul_dtype=jnp.bfloat16)
    check(out, ref, "resident multi-chunk ragged", 1e-2, 1e-2)

    # 3) Weight-streaming fallback (v7x residency guard), forced at small shapes.
    for pre in (False, True):
        out = positionwise_ff(x2, *params2, pre_lnorm=pre, inner_chunk=128,
                              force_stream=True)
        ref = _reference(x2, *params2, pre_lnorm=pre, matmul_dtype=jnp.bfloat16)
        check(out, ref, f"streamed pre_lnorm={pre}", 1e-2, 1e-2)

    # 4) bf16 activations + weights (native bf16 MXU, bf16 output).
    xb = x.astype(jnp.bfloat16)
    params_b = tuple(p.astype(jnp.bfloat16) for p in params)
    out = positionwise_ff(xb, *params_b, pre_lnorm=False)
    ref = _reference(xb, *params_b, pre_lnorm=False, matmul_dtype=jnp.bfloat16)
    assert out.dtype == jnp.bfloat16 and out.shape == xb.shape
    check(out, ref, "bf16", 5e-2, 5e-2)

    print("KERNEL_OK")
</pallas_src>

<mosaic_0001>
module attributes {stable_mosaic.version = 11 : i64} {
  func.func @_ff_resident_kernel(%arg0: i32, %arg1: memref<8x32xf32, #tpu.memory_space<vmem>>, %arg2: memref<32x64xbf16, #tpu.memory_space<vmem>>, %arg3: memref<1x64xf32, #tpu.memory_space<vmem>>, %arg4: memref<64x32xbf16, #tpu.memory_space<vmem>>, %arg5: memref<1x32xf32, #tpu.memory_space<vmem>>, %arg6: memref<1x32xf32, #tpu.memory_space<vmem>>, %arg7: memref<1x32xf32, #tpu.memory_space<vmem>>, %arg8: memref<8x32xf32, #tpu.memory_space<vmem>>) attributes {dimension_semantics = [#tpu.dimension_semantics<parallel>], iteration_bounds = array<i64: 2>, scalar_prefetch = 0 : i64, scratch_operands = 0 : i64, tpu.core_type = #tpu.core_type<tc>, window_params = [{transform_indices = @transform_0, window_bounds = array<i64: 8, 32>}, {pipeline_mode = #tpu.pipeline_mode<synchronous>, transform_indices = @transform_1, window_bounds = array<i64: 32, 64>}, {pipeline_mode = #tpu.pipeline_mode<synchronous>, transform_indices = @transform_2, window_bounds = array<i64: 1, 64>}, {pipeline_mode = #tpu.pipeline_mode<synchronous>, transform_indices = @transform_3, window_bounds = array<i64: 64, 32>}, {pipeline_mode = #tpu.pipeline_mode<synchronous>, transform_indices = @transform_4, window_bounds = array<i64: 1, 32>}, {pipeline_mode = #tpu.pipeline_mode<synchronous>, transform_indices = @transform_5, window_bounds = array<i64: 1, 32>}, {pipeline_mode = #tpu.pipeline_mode<synchronous>, transform_indices = @transform_6, window_bounds = array<i64: 1, 32>}, {transform_indices = @transform_7, window_bounds = array<i64: 8, 32>}]} {
    %c0 = arith.constant 0 : index
    %c0_0 = arith.constant 0 : index
    %0 = vector.load %arg6[%c0, %c0_0] : memref<1x32xf32, #tpu.memory_space<vmem>>, vector<1x32xf32>
    %c0_1 = arith.constant 0 : index
    %c0_2 = arith.constant 0 : index
    %1 = vector.load %arg7[%c0_1, %c0_2] : memref<1x32xf32, #tpu.memory_space<vmem>>, vector<1x32xf32>
    %c0_3 = arith.constant 0 : index
    %c0_4 = arith.constant 0 : index
    %2 = vector.load %arg5[%c0_3, %c0_4] : memref<1x32xf32, #tpu.memory_space<vmem>>, vector<1x32xf32>
    %c0_5 = arith.constant 0 : index
    %c0_6 = arith.constant 0 : index
    %3 = vector.load %arg1[%c0_5, %c0_6] : memref<8x32xf32, #tpu.memory_space<vmem>>, vector<8x32xf32>
    %4 = arith.truncf %3 : vector<8x32xf32> to vector<8x32xbf16>
    %cst = arith.constant 0.000000e+00 : f32
    %5 = vector.broadcast %cst : f32 to vector<8x32xf32>
    %c0_7 = arith.constant 0 : index
    %c0_8 = arith.constant 0 : index
    %6 = vector.load %arg2[%c0_7, %c0_8] : memref<32x64xbf16, #tpu.memory_space<vmem>>, vector<32x64xbf16>
    %cst_9 = arith.constant dense<0.000000e+00> : vector<8x64xf32>
    %7 = tpu.matmul %4, %6, %cst_9 {dimension_numbers = #tpu.dot_dimension_numbers<[1], [0], [0], [1], [0, 0, 1, 1], [], []>} : vector<8x32xbf16>, vector<32x64xbf16>, vector<8x64xf32> -> vector<8x64xf32>
    %c0_10 = arith.constant 0 : index
    %c0_11 = arith.constant 0 : index
    %8 = vector.load %arg3[%c0_10, %c0_11] : memref<1x64xf32, #tpu.memory_space<vmem>>, vector<1x64xf32>
    %9 = vector.broadcast %8 : vector<1x64xf32> to vector<8x64xf32>
    %10 = arith.addf %7, %9 : vector<8x64xf32>
    %cst_12 = arith.constant 0.000000e+00 : f32
    %11 = vector.broadcast %cst_12 : f32 to vector<8x64xf32>
    %12 = arith.maximumf %10, %11 : vector<8x64xf32>
    %13 = arith.truncf %12 : vector<8x64xf32> to vector<8x64xbf16>
    %c0_13 = arith.constant 0 : index
    %c0_14 = arith.constant 0 : index
    %14 = vector.load %arg4[%c0_13, %c0_14] : memref<64x32xbf16, #tpu.memory_space<vmem>>, vector<64x32xbf16>
    %cst_15 = arith.constant dense<0.000000e+00> : vector<8x32xf32>
    %15 = tpu.matmul %13, %14, %cst_15 {dimension_numbers = #tpu.dot_dimension_numbers<[1], [0], [0], [1], [0, 0, 1, 1], [], []>} : vector<8x64xbf16>, vector<64x32xbf16>, vector<8x32xf32> -> vector<8x32xf32>
    %16 = arith.addf %5, %15 : vector<8x32xf32>
    %17 = vector.broadcast %2 : vector<1x32xf32> to vector<8x32xf32>
    %18 = arith.addf %16, %17 : vector<8x32xf32>
    %19 = arith.addf %3, %18 : vector<8x32xf32>
    %cst_16 = arith.constant dense<0.000000e+00> : vector<8xf32>
    %20 = vector.multi_reduction <add>, %19, %cst_16 [1] : vector<8x32xf32> to vector<8xf32>
    %21 = vector.shape_cast %20 : vector<8xf32> to vector<8x1xf32>
    %22 = arith.mulf %19, %19 : vector<8x32xf32>
    %cst_17 = arith.constant dense<0.000000e+00> : vector<8xf32>
    %23 = vector.multi_reduction <add>, %22, %cst_17 [1] : vector<8x32xf32> to vector<8xf32>
    %24 = vector.shape_cast %23 : vector<8xf32> to vector<8x1xf32>
    %cst_18 = arith.constant 3.125000e-02 : f32
    %25 = vector.broadcast %cst_18 : f32 to vector<8x1xf32>
    %26 = arith.mulf %21, %25 : vector<8x1xf32>
    %cst_19 = arith.constant 3.125000e-02 : f32
    %27 = vector.broadcast %cst_19 : f32 to vector<8x1xf32>
    %28 = arith.mulf %24, %27 : vector<8x1xf32>
    %29 = arith.mulf %26, %26 : vector<8x1xf32>
    %30 = arith.subf %28, %29 : vector<8x1xf32>
    %cst_20 = arith.constant 0.000000e+00 : f32
    %31 = vector.broadcast %cst_20 : f32 to vector<8x1xf32>
    %32 = arith.maximumf %30, %31 : vector<8x1xf32>
    %33 = vector.broadcast %26 : vector<8x1xf32> to vector<8x32xf32>
    %34 = arith.subf %19, %33 : vector<8x32xf32>
    %cst_21 = arith.constant 9.99999974E-6 : f32
    %35 = vector.broadcast %cst_21 : f32 to vector<8x1xf32>
    %36 = arith.addf %32, %35 : vector<8x1xf32>
    %37 = math.rsqrt %36 : vector<8x1xf32>
    %38 = vector.broadcast %37 : vector<8x1xf32> to vector<8x32xf32>
    %39 = arith.mulf %34, %38 : vector<8x32xf32>
    %40 = vector.broadcast %0 : vector<1x32xf32> to vector<8x32xf32>
    %41 = arith.mulf %39, %40 : vector<8x32xf32>
    %42 = vector.broadcast %1 : vector<1x32xf32> to vector<8x32xf32>
    %43 = arith.addf %41, %42 : vector<8x32xf32>
    %c0_22 = arith.constant 0 : index
    %c0_23 = arith.constant 0 : index
    %44 = vector.load %arg8[%c0_22, %c0_23] : memref<8x32xf32, #tpu.memory_space<vmem>>, vector<8x32xf32>
    tpu.vector_store %arg8[%c0_22, %c0_23], %43 {strides = array<i32>} : memref<8x32xf32, #tpu.memory_space<vmem>>, vector<8x32xf32>,
    return
  }
  func.func @transform_0(%arg0: i32) -> (i32, i32) {
    %c0_i32 = arith.constant 0 : i32
    %c0_i32_0 = arith.constant 0 : i32
    return %arg0, %c0_i32 : i32, i32
  }
  func.func @transform_1(%arg0: i32) -> (i32, i32) {
    %c0_i32 = arith.constant 0 : i32
    %c0_i32_0 = arith.constant 0 : i32
    %c0_i32_1 = arith.constant 0 : i32
    return %c0_i32, %c0_i32_0 : i32, i32
  }
  func.func @transform_2(%arg0: i32) -> (i32, i32) {
    %c0_i32 = arith.constant 0 : i32
    %c0_i32_0 = arith.constant 0 : i32
    %c0_i32_1 = arith.constant 0 : i32
    return %c0_i32, %c0_i32_0 : i32, i32
  }
  func.func @transform_3(%arg0: i32) -> (i32, i32) {
    %c0_i32 = arith.constant 0 : i32
    %c0_i32_0 = arith.constant 0 : i32
    %c0_i32_1 = arith.constant 0 : i32
    return %c0_i32, %c0_i32_0 : i32, i32
  }
  func.func @transform_4(%arg0: i32) -> (i32, i32) {
    %c0_i32 = arith.constant 0 : i32
    %c0_i32_0 = arith.constant 0 : i32
    %c0_i32_1 = arith.constant 0 : i32
    return %c0_i32, %c0_i32_0 : i32, i32
  }
  func.func @transform_5(%arg0: i32) -> (i32, i32) {
    %c0_i32 = arith.constant 0 : i32
    %c0_i32_0 = arith.constant 0 : i32
    %c0_i32_1 = arith.constant 0 : i32
    return %c0_i32, %c0_i32_0 : i32, i32
  }
  func.func @transform_6(%arg0: i32) -> (i32, i32) {
    %c0_i32 = arith.constant 0 : i32
    %c0_i32_0 = arith.constant 0 : i32
    %c0_i32_1 = arith.constant 0 : i32
    return %c0_i32, %c0_i32_0 : i32, i32
  }
  func.func @transform_7(%arg0: i32) -> (i32, i32) {
    %c0_i32 = arith.constant 0 : i32
    %c0_i32_0 = arith.constant 0 : i32
    return %arg0, %c0_i32 : i32, i32
  }
}

</mosaic_0001>

<bundles_post_ra>
// kernel: tpu_custom_call.1
= control target key start
LH: loop header
LB: loop body
LE: loop exit
PB: predicated region body
PF: predicated region fallthrough
CT: control target
= control target key end

     0   :  { %12 = vsyncpa [#allocation3], 0  ;;  %s876_s0 = inlined_call_operand.vmem [shape: f32[16,32], index: 0, kind: input, shape index: {}]   ;;  %s877_s1 = inlined_call_operand.vmem [shape: bf16[32,64], index: 1, kind: input, shape index: {}]   ;;  %s878_s2 = inlined_call_operand.vmem [shape: f32[1,64], index: 2, kind: input, shape index: {}]   ;;  %s879_s3 = inlined_call_operand.vmem [shape: bf16[64,32], index: 3, kind: input, shape index: {}]   ;;  %s880_s4 = inlined_call_operand.vmem [shape: f32[1,32], index: 4, kind: input, shape index: {}]   ;;  %s881_s5 = inlined_call_operand.vmem [shape: f32[1,32], index: 5, kind: input, shape index: {}]   ;;  %s882_s6 = inlined_call_operand.vmem [shape: f32[1,32], index: 6, kind: input, shape index: {}]   ;;  %s883_s7 = inlined_call_operand.hbm [shape: f32[16,32], index: 7, kind: output, shape index: {}]  }
   0x1   :  { %14 = vsyncpa [#allocation3 + $0x1], 0  ;;  %s742_s24 = smov 0   ;;  %s744_s25 = smov 0  }
   0x2   :  { %s746_s26 = smov 0   ;;  %s748_s27 = smov 0  }
   0x3 LB: > { %s763_s28 = sadd.s32 4294967295, %s697_s27   ;;  %s536_s29 = sadd.s32 4294967294, %s697_s27   ;;  %s697_s27 = sphi %s748_s27, %s889_s27   ;;  %s693_s26 = sphi %s746_s26, %s888_s26   ;;  %s689_s25 = sphi %s744_s25, %s887_s25   ;;  %s685_s24 = sphi %s742_s24, %s886_s24  }
   0x4   : > { %s767_s30 = sadd.s32 1, %s697_s27   ;;  %s179_s8 = sadd.s32 1, %s693_s26 }
   0x5   : > { %s176_s9 = ssub.s32 %s697_s27, %s767_s30  ;;  %p189_p0 = scmp.ne.s32.totalorder %s693_s26, %s689_s25 }
   0x6   : > { %p177_p1 = scmp.eq.s32.totalorder %s176_s9, 0  ;;  %p190_p2 = scmp.eq.s32.totalorder %s763_s28, 1 }
   0x7   : > { %p195_p3 = scmp.ne.s32.totalorder %s689_s25, %s685_s24  ;;  %p196_p4 = scmp.eq.s32.totalorder %s536_s29, 1 }
   0x8   : > { %s778_s10 = scalar_select %p177_p1, %s693_s26, %s179_s8  }
   0x9   : > { %p780_p5 = por %p190_p2, %p189_p0  ;;  %p784_p6 = por %p196_p4, %p195_p3 }
   0xa   : > { %p539_p7 = scmp.ge.s32.totalorder %s697_s27, 1  ;;  %p239_p8 = scmp.lt.s32.totalorder %s697_s27, 3 }
   0xc   : > { %p240_p9 = pnand %p539_p7, %p239_p8 }
   0xd   : > { %v627_v0 = vld [vmem:[%s877_s1] sm:$0xff] (!%p240_p9)   ;;  %v699_v1 = vmov (!%p240_p9), 0.0   ;;  %v628_v2 = vld [vmem:[%s877_s1 + $0x8] sm:$0xff] (!%p240_p9)   ;;  %vm700_vm0 = vmmov (!%p240_p9), 0   ;;  %p270_p10 = scmp.lt.s32.totalorder (!%p240_p9), %s763_s28, 1  ;;  %vm303_vm1 = vcmask (!%p240_p9), 261120  }
   0xe   : > { %243 = sbr.rel (%p240_p9) target bundleno = 648 (0x288), region = 48  ;;  %566 = vmatprep.subr.bf16.mxu0 (!%p240_p9), %v699_v1  ;;  %574 = vmatprep.subr.bf16.mxu1 (!%p240_p9), %v699_v1  ;;  %v629_v3 = vld [vmem:[%s879_s3] sm:$0xff] (!%p240_p9)   ;;  %v630_v4 = vld [vmem:[%s879_s3 + $0x8] sm:$0xff] (!%p240_p9)   ;;  %v631_v7 = vld [vmem:[%s879_s3 + $0x10] sm:$0xff] (!%p240_p9)   ;;  %vm387_vm2 = vcmask (!%p240_p9), 523264   ;;  %s267_s20 = sand.u32 (!%p240_p9), 1, %s689_s25  }
   0xf   : > { %567 = vmatpush3.bf16.msra.mxu0 (!%p240_p9), %v627_v0  ;;  %570 = vmatprep.mubr.msk.bf16.mxu0 (!%p240_p9), %vm700_vm0, %v699_v1  ;;  %v632_v8 = vld [vmem:[%s879_s3 + $0x18] sm:$0xff] (!%p240_p9)   ;;  %v542_v9 = vld [vmem:[%s878_s2] ss:$0 sm:$0xff] (!%p240_p9)  ;;  %s540_s21 = sshll.u32 (!%p240_p9), %s267_s20, 3  ;;  %s555_s9 = sshll.u32 (!%p240_p9), %s763_s28, 7 }
  0x10   : > { %568 = vmatprep.subr.bf16.mxu0 (!%p240_p9), %v699_v1  ;;  %582 = vmatprep.mubr.msk.bf16.mxu1 (!%p240_p9), %vm700_vm0, %v699_v1  ;;  %v546_v17 = vld [vmem:[%s880_s4] ss:$0 sm:$0xff] (!%p240_p9)  ;;  %s269_s13 = scalar_lea.vmem (!%p240_p9), [#allocation2], %s540_s21  ;;  %s833_s17 = scalar_lea.hbm (!%p240_p9), %s883_s7, %s555_s9 }
  0x11   : > { %575 = vmatpush3.bf16.msra.mxu1 (!%p240_p9), %v629_v3  ;;  %v552_v37 = vld [vmem:[%s881_s5] ss:$0 sm:$0xff] (!%p240_p9)  ;;  %s477_s14 = sshll.u32 (!%p240_p9), %s269_s13, 4  ;;  %s464_s18 = scalar_lea.sflag (!%p240_p9), [#allocation3], %s267_s20  ;;  %s835_s14 = int_to_ptr.vmem [resolvable:$true] %s477_s14 }
  0x12   : > { %576 = vmatprep.subr.bf16.mxu1 (!%p240_p9), %v699_v1  ;;  %v553_v39 = vld [vmem:[%s882_s6] ss:$0 sm:$0xff] (!%p240_p9) }
  0x13   : > { %569 = vmatpush3.bf16.msra.mxu0 (!%p240_p9), %v628_v2 }
  0x15   : > { %s271_s19 = scalar_select %p270_p10, %s763_s28, 1  ;;  %577 = vmatpush3.bf16.msra.mxu1 %v630_v4 }
  0x16   : > { %578 = vmatprep.subr.bf16.mxu1 %v699_v1  ;;  %s701_s28 = smov [#allocation2]  }
  0x17   : > { %s541_s22 = sshll.u32 %s271_s19, 3  ;;  %s635_s19 = scalar_lea.vmem %s835_s14, 128 }
  0x18   : > { %s273_s8 = scalar_lea.vmem %s876_s0, %s541_s22  ;;  %p636_p11 = scmp.ne.s32.totalorder %s835_s14, %s635_s19 }
  0x19   : > { %v278_v5 = vld [vmem:[%s273_s8] sm:$0xff]  ;;  %579 = vmatpush3.bf16.msra.mxu1 %v631_v7  ;;  %s639_s21 = sshll.u32 %s701_s28, 4  ;;  %s640_s21 = int_to_ptr.vmem [resolvable:$false] %s639_s21 }
  0x1a   : > { %v279_v6 = vpack.c.bf16 %v278_v5, %v278_v5  ;;  %580 = vmatprep.subr.bf16.mxu1 %v699_v1  ;;  %p637_p12 = pnand %p636_p11, %p780_p5  ;;  %s641_s22 = scalar_lea.vmem %s640_s21, 256 }
  0x1b   : > { %p642_p0 = scmp.lt.s32.totalorder %s835_s14, %s640_s21  ;;  %p643_p1 = scmp.lt.s32.totalorder %s641_s22, %s635_s19 }
  0x1c   : > { %571 = vmatmul.mubr.msk.bf16.vlgmr.msra.gmra.mrb[0].mxu0 %vm303_vm1, %v279_v6  ;;  %p638_p13 = pneg %p637_p12 }
  0x1d   : > { %581 = vmatpush3.bf16.msra.mxu1 %v632_v8  ;;  %p644_p2 = por %p643_p1, %p642_p0 }
  0x1f   : > { %p645_p3 = pnand %p644_p2, %p638_p13 }
  0xef   : > { %v341_v10 = vpop.f32.mrb[0].mxu0 }
  0xf0   : > { %v342_v11 = vadd.f32 %v542_v9, %v341_v10  ;;  %v572_v12 = vpop.f32.mrb[1].mxu0 }
  0xf1   : > { %v344_v13 = vpop.f32.mrb[2].mxu0 }
  0xf2   : > { %v347_v14 = vmax.f32 %v342_v11, 0.0  ;;  %v573_v15 = vpop.f32.mrb[3].mxu0 }
  0xf4   : > { %v348_v16 = vpack.c.bf16 %v347_v14, %v347_v14 }
  0xf6   : > { %583 = vmatmul.mubr.msk.bf16.vlgmr.msra.gmra.mrb[0].mxu1 %vm387_vm2, %v348_v16 }
 0x1c9   : > { %v425_v18 = vpop.f32.mrb[0].mxu1 }
 0x1ca   : > { %v426_v19 = vadd.f32 %v546_v17, %v425_v18  ;;  %v584_v20 = vpop.f32.mrb[1].mxu1 }
 0x1cb   : > { %v428_v21 = vpop.f32.mrb[2].mxu1 }
 0x1cc   : > { %v431_v22 = vadd.f32 %v426_v19, %v278_v5  ;;  %v585_v23 = vpop.f32.mrb[3].mxu1 }
 0x1ce   : > { %v432_v24 = vsel %vm303_vm1, %v431_v22, 0.0  ;;  %v435_v25 = vmul.f32 %v431_v22, %v431_v22 }
 0x1cf   : > { %433 = vadd.xlane.f32.xlu0 %v432_v24 }
 0x1d0   : > { %v436_v26 = vsel %vm303_vm1, %v435_v25, 0.0 }
 0x1d3   : > { %437 = vadd.xlane.f32.xlu0 %v436_v26 }
 0x25c   : > { %v434_v27 = vpop.xlane.xlu0 %433 }
 0x25d   : > { %v439_v28 = vmul.f32 0.03125, %v434_v27 }
 0x25f   : > { %v441_v30 = vmul.f32 %v439_v28, %v439_v28  ;;  %v444_v35 = vsub.f32 %v431_v22, %v439_v28 }
 0x260   : > { %v438_v29 = vpop.xlane.xlu0 %437 }
 0x261   : > { %v440_v31 = vmul.f32 0.03125, %v438_v29 }
 0x263   : > { %v442_v32 = vsub.f32 %v440_v31, %v441_v30 }
 0x265   : > { %v443_v33 = vmax.f32 %v442_v32, 0.0 }
 0x267   : > { %v445_v34 = vadd.f32 1e-05, %v443_v33 }
 0x269   : > { %633 = vrsqrt.f32 %v445_v34 }
 0x273   : > { %v634_v36 = vpop.eup %633 }
 0x274   : > { %v447_v38 = vmul.f32 %v634_v36, %v444_v35 }
 0x276   : > { %v454_v40 = vmul.f32 %v552_v37, %v447_v38 }
 0x278   : > { %v461_v41 = vadd.f32 %v553_v39, %v454_v40 }
 0x27a   : > { %462 = vst.msk [vmem:[%s269_s13] sm:$0xff] %vm303_vm1, %v461_v41 }
 0x27b   : > { %648 = shalt.err (!%p645_p3)
}
 0x27c   : > { %s649_s20 = scalar_lea.hbm %s833_s17, 128  ;;  %s653_s8 = scalar_lea.hbm %s883_s7, 256 }
 0x27d   : > { %p650_p4 = scmp.ne.s32.totalorder %s833_s17, %s649_s20  ;;  %p654_p9 = scmp.lt.u32.totalorder %s833_s17, %s883_s7 }
 0x27e   : > { %p655_p10 = scmp.lt.u32.totalorder %s653_s8, %s649_s20  ;;  %p657_p12 = scmp.lt.u32.totalorder %s649_s20, %s833_s17 }
 0x27f   : > { %p651_p7 = pnand %p650_p4, %p780_p5 }
 0x280   : > { %p656_p11 = por %p655_p10, %p654_p9 }
 0x281   : > { %p652_p8 = pneg %p651_p7 }
 0x282   : > { %p658_p13 = por %p657_p12, %p656_p11 }
 0x284   : > { %p659_p0 = pnand %p658_p13, %p652_p8 }
 0x286   : > { %662 = shalt.err (!%p659_p0)
}
 0x287   : > { %586 = dma.vmem_to_hbm [thread:$0]  (%p780_p5), %s835_s14, 128, %s833_s17, %s464_s18  }
 0x288 PF: > { %p592_p1 = scmp.ge.s32.totalorder %s697_s27, 2  ;;  %s489_s15 = sand.u32 1, %s685_s24  }
 0x289   : > { %s490_s16 = scalar_lea.sflag [#allocation3], %s489_s15 }
 0x28a   : > { %p589_p2 = pnand %p592_p1, %p784_p6 }
 0x28c   : > { %680 = dma.done.wait (!%p589_p2), %s490_s16, 128  }
 0x28d   : > { %682 = vsyncadd (!%p589_p2), %s490_s16, 4294967168  ;;  %p17_p3 = scmp.ge.s32.totalorder %s767_s30, 4   ;;  %s886_s24 = smov %s689_s25 }
 0x28e   : > { %s887_s25 = smov %s693_s26  ;;  %s888_s26 = smov %s778_s10 }
 0x28f   : > { %s889_s27 = smov %s767_s30  ;;  %19 = sbr.rel (!%p17_p3) target bundleno = 3 (0x3), region = 83 }
 0x296   :  { %495 = vsyncpa [#allocation3], 1 }
 0x297   :  { %497 = vsyncpa [#allocation3 + $0x1], 1 }

</bundles_post_ra>
